<compile_context>
chip_gen: v7x
topology: tpu7x:2x2x1
jax: 0.10.0
libtpu: 0.0.40
codegen_flags: <defaults>
</compile_context>

<pallas_src>
import jax
import jax.numpy as jnp
from jax.experimental import pallas as pl
from jax.experimental.pallas import tpu as pltpu

EPS = 1e-6
NUM_CLASSES = 10
MAX_IMVOTE_PER_PIXEL = 3
SEED_CHUNK = 128          # seeds processed per inner iteration (one lane-width)


def _vote_fusion_kernel(seed_ref, bboxc_ref, bboxp_ref, out_ref):
    nb = bboxc_ref.shape[1]                 # padded bbox count (multiple of 8)
    ts = seed_ref.shape[2]                  # seeds in this block (multiple of 128)
    n_chunks = ts // SEED_CHUNK

    # per-bbox columns broadcast to full (nb, 128) vregs ONCE per program (JAX does not
    # CSE broadcast_in_dim, so doing this inside the chunk loop re-issues the broadcasts).
    l_b = jnp.broadcast_to(bboxc_ref[0, :, 0:1], (nb, SEED_CHUNK))
    t_b = jnp.broadcast_to(bboxc_ref[0, :, 1:2], (nb, SEED_CHUNK))
    r_b = jnp.broadcast_to(bboxc_ref[0, :, 2:3], (nb, SEED_CHUNK))
    b_b = jnp.broadcast_to(bboxc_ref[0, :, 3:4], (nb, SEED_CHUNK))
    conf_b = jnp.broadcast_to(bboxc_ref[0, :, 4:5], (nb, SEED_CHUNK))
    params = bboxp_ref[0, :, :]             # (16, nb) selection matrix fed to the MXU

    # bbox-index iota on the sublane axis, hoisted and shared by all chunks / k iterations
    sub_iota = jax.lax.broadcasted_iota(jnp.int32, (nb, SEED_CHUNK), 0)

    def process_chunk(lo):
        sl = pl.ds(lo, SEED_CHUNK)
        u = seed_ref[0, 0:1, sl]            # (1, 128) rows: seeds on lanes -> dense slices
        v = seed_ref[0, 1:2, sl]
        zf = seed_ref[0, 2:3, sl]           # z_cam / focal (precomputed, no in-kernel divide)
        sx = seed_ref[0, 3:4, sl]
        sy = seed_ref[0, 4:5, sl]
        sz = seed_ref[0, 5:6, sl]
        rt00 = seed_ref[0, 6:7, sl]
        rt10 = seed_ref[0, 7:8, sl]
        rt20 = seed_ref[0, 8:9, sl]
        rt01 = seed_ref[0, 9:10, sl]
        rt11 = seed_ref[0, 10:11, sl]
        rt21 = seed_ref[0, 11:12, sl]

        # pairwise scores (nb, 128): bbox on sublanes, seed on lanes
        in_bbox = (u > l_b) & (u < r_b) & (v > t_b) & (v < b_b)
        scores = in_bbox.astype(jnp.float32) + conf_b

        # ---- top-k selection for all slots (pure VPU/XLU, no matmul yet) ----
        onehots, tops = [], []
        for k in range(MAX_IMVOTE_PER_PIXEL):
            m = jnp.max(scores, axis=0, keepdims=True)                    # (1, 128) top score
            arg = jnp.min(jnp.where(scores == m, sub_iota, nb),
                          axis=0, keepdims=True)                          # lowest index on ties
            onehot = sub_iota == arg                                      # (nb, 128)
            onehots.append(onehot)
            tops.append(m)
            if k + 1 < MAX_IMVOTE_PER_PIXEL:
                scores = jnp.where(onehot, -jnp.inf, scores)

        # ---- one MXU matmul gathers the selected bbox params for ALL slots ----
        onehot_all = jnp.concatenate(onehots, axis=1).astype(jnp.float32)  # (nb, 3*128)
        sel_all = jnp.dot(params, onehot_all,
                          preferred_element_type=jnp.float32)              # (16, 3*128)

        for k in range(MAX_IMVOTE_PER_PIXEL):
            sel = sel_all[:, k * SEED_CHUNK:(k + 1) * SEED_CHUNK]          # lane-aligned slice
            m = tops[k]
            midx = sel[0:1]
            midy = sel[1:2]
            conf_s = sel[2:3]
            sem_s = sel[3:3 + NUM_CLASSES]                                 # (10, 128)

            # selected pair's in-bbox flag recovered exactly from the pair score
            # (one-hot matmul of exact 0/1 weights is exact, so m - conf_s is exactly 0 or 1)
            inb = ((m - conf_s) > 0.5).astype(jnp.float32)

            du = (midx - u) * zf
            dv = (midy - v) * zf
            # Coord3DMode.convert_point([du, dv, 0], CAM, DEPTH, rt_mat=Rt) == [du, dv, 0] @ Rt.T
            rx = sx + du * rt00 + dv * rt01
            ry = sy + du * rt10 + dv * rt11
            rz = sz + du * rt20 + dv * rt21
            # exact sqrt / division for parity with torch (EUP slot is not the bottleneck)
            inv_norm = 1.0 / jnp.sqrt(rx * rx + ry * ry + rz * rz + EPS)
            rx = rx * inv_norm
            ry = ry * inv_norm
            rz = rz * inv_norm
            inv_den = 1.0 / (ry + EPS)
            xz0 = rx * inv_den * sy - sx
            xz1 = rz * inv_den * sy - sz

            tile = jnp.concatenate(
                [xz0 * inb, xz1 * inb, rx * inb, ry * inb, rz * inb,
                 sem_s * inb, m], axis=0)                                  # (16, 128)
            # dense store: 16 sublanes x 128 lanes = 2 unmasked vregs per slot per chunk
            out_ref[0, k, :, sl] = tile

    if n_chunks == 1:
        process_chunk(0)
    else:
        # non-unrolled loop keeps vreg pressure / code size bounded for large seed tiles
        @pl.loop(0, n_chunks)
        def _(c):
            process_chunk(pl.multiple_of(c * SEED_CHUNK, SEED_CHUNK))


def vote_fusion(imgs, bboxes_2d, seeds_3d, Rt, K, seed_tile=2048):
    """Forward pass of VoteFusion. Returns (img_features (B, 18, 3N), mask (B, 3N) bool)."""
    B, N, _ = seeds_3d.shape
    bbox_num = bboxes_2d.shape[1]
    _, _, H, W = imgs.shape

    Rt = Rt.astype(jnp.float32)
    K = K.astype(jnp.float32)

    # ---- geometry glue (plain JAX) ----
    # TODO(synk): apply_3d_transformation / coord_2d_transform / bbox_2d_transform assumed
    # identity (no pcd augmentation, scale_factor=1, no flip in img_meta).
    xyz_depth = seeds_3d.astype(jnp.float32)
    xyz_cam = jnp.einsum('bnj,bij->bni', xyz_depth, Rt)          # points @ Rt.T (depth -> cam)
    proj = jnp.einsum('bnj,bij->bni', xyz_cam, K)                # points_cam2img
    uv = proj[..., :2] / proj[..., 2:3]
    uv_origin = jnp.round(uv - 1.0)
    uv_rescaled = uv_origin
    z_cam = xyz_cam[..., 2]

    if bbox_num == 0:
        two_cues = jnp.zeros((B, 15, MAX_IMVOTE_PER_PIXEL * N), jnp.float32)
        mask = jnp.concatenate(
            [jnp.ones((B, N), bool),
             jnp.zeros((B, (MAX_IMVOTE_PER_PIXEL - 1) * N), bool)], axis=1)
    else:
        assert N % SEED_CHUNK == 0, "seed_num must be a multiple of 128"

        # seed rows (B, 16, N): seeds on the last (lane) axis
        calib_rows = jnp.stack([Rt[:, 0, 0], Rt[:, 1, 0], Rt[:, 2, 0],
                                Rt[:, 0, 1], Rt[:, 1, 1], Rt[:, 2, 1]], axis=-1)  # (B, 6)
        rows = [uv_origin[..., 0], uv_origin[..., 1],
                z_cam / K[:, 0, 0][:, None],
                xyz_depth[..., 0], xyz_depth[..., 1], xyz_depth[..., 2]]
        rows += [jnp.broadcast_to(calib_rows[:, j:j + 1], (B, N)) for j in range(6)]
        rows += [jnp.zeros((B, N), jnp.float32)] * 4
        seed_pack = jnp.stack(rows, axis=1).astype(jnp.float32)             # (B, 16, N)

        # bbox packing: pad only to a multiple of 8 (full-extent BlockSpecs -> sublane
        # alignment is the only constraint; cuts all per-k VPU/XLU work vs padding to 128)
        nb_pad = max(8, -(-bbox_num // 8) * 8)
        bb = bboxes_2d.astype(jnp.float32)                       # [l, t, r, b, conf, cls]
        bbox_cols = jnp.zeros((B, nb_pad, 8), jnp.float32)
        bbox_cols = bbox_cols.at[:, :bbox_num, 0:5].set(bb[..., 0:5])

        midx = (bb[..., 0] + bb[..., 2]) * 0.5
        midy = (bb[..., 1] + bb[..., 3]) * 0.5
        sem = jax.nn.one_hot(bb[..., 5].astype(jnp.int32), NUM_CLASSES,
                             dtype=jnp.float32) * bb[..., 4:5]   # (B, bbox_num, 10)
        bbox_par = jnp.zeros((B, 16, nb_pad), jnp.float32)
        bbox_par = bbox_par.at[:, 0, :bbox_num].set(midx)
        bbox_par = bbox_par.at[:, 1, :bbox_num].set(midy)
        bbox_par = bbox_par.at[:, 2, :bbox_num].set(bb[..., 4])
        bbox_par = bbox_par.at[:, 3:3 + NUM_CLASSES, :bbox_num].set(
            jnp.transpose(sem, (0, 2, 1)))

        # block size along the seed axis: big blocks amortise per-grid-step overhead on
        # single-TC v5e/v6e (VMEM footprint is tiny); keep >= 2 programs so both v7x TCs
        # get work -- the extra grid step is negligible on single-TC chips.
        ts = SEED_CHUNK
        while ts * 2 <= min(seed_tile, N) and N % (ts * 2) == 0:
            ts *= 2
        if B * (N // ts) < 2 and ts > SEED_CHUNK:
            ts //= 2

        out = pl.pallas_call(
            _vote_fusion_kernel,
            out_shape=jax.ShapeDtypeStruct(
                (B, MAX_IMVOTE_PER_PIXEL, 16, N), jnp.float32),
            grid_spec=pltpu.PrefetchScalarGridSpec(
                num_scalar_prefetch=0,
                grid=(B, N // ts),
                in_specs=[
                    pl.BlockSpec((1, 16, ts), lambda b, s: (b, 0, s)),
                    pl.BlockSpec((1, nb_pad, 8), lambda b, s: (b, 0, 0)),
                    pl.BlockSpec((1, 16, nb_pad), lambda b, s: (b, 0, 0)),
                ],
                out_specs=pl.BlockSpec((1, MAX_IMVOTE_PER_PIXEL, 16, ts),
                                       lambda b, s: (b, 0, 0, s)),
            ),
            compiler_params=pltpu.CompilerParams(
                dimension_semantics=("parallel", "parallel")),
        )(seed_pack, bbox_cols, bbox_par)

        # (B, slot, 16, seed) -> (B, 16, slot, seed) -> (B, 16, slot*N + seed): matches
        # the torch transpose/reshape ordering (flat index = slot * seed_num + seed).
        feat = jnp.transpose(out, (0, 2, 1, 3)).reshape(B, 16, MAX_IMVOTE_PER_PIXEL * N)
        two_cues = feat[:, :15]
        # row 15 holds the raw topk pair score; floor().int().bool() exactly as torch does
        mask = jnp.floor(feat[:, 15]).astype(jnp.int32).astype(bool)

    # ---- texture cue (pixel gather glue) ----
    img_flat = imgs.reshape(B, 3, H * W).astype(jnp.float32) / 255.0
    # TODO(synk): torch indexes unclamped pixels (UB for out-of-image seeds); clamp for safety.
    u_pix = jnp.clip(jnp.round(uv_rescaled[..., 0]), 0, W - 1)
    v_pix = jnp.clip(jnp.round(uv_rescaled[..., 1]), 0, H - 1)
    uv_idx = (v_pix * W + u_pix).astype(jnp.int32)
    txt = jnp.take_along_axis(
        img_flat, jnp.broadcast_to(uv_idx[:, None, :], (B, 3, N)), axis=2)
    txt_cue = jnp.tile(txt, (1, 1, MAX_IMVOTE_PER_PIXEL))        # flat = slot*N + seed
    img_feature = jnp.concatenate([two_cues, txt_cue], axis=1)   # (B, 18, 3N)
    return img_feature, mask


if __name__ == "__main__":
    key = jax.random.PRNGKey(0)
    B, N, bbox_num = 2, 256, 5
    H = W = 48

    k1, k2, k3, k4, k5, k6 = jax.random.split(key, 6)
    # seeds in DEPTH coords: x, z in [-1, 1], y (forward) in [2, 4] so they project inside the image
    sx = jax.random.uniform(k1, (B, N), minval=-1.0, maxval=1.0)
    sy = jax.random.uniform(k2, (B, N), minval=2.0, maxval=4.0)
    sz = jax.random.uniform(k3, (B, N), minval=-1.0, maxval=1.0)
    seeds_3d = jnp.stack([sx, sy, sz], axis=-1).astype(jnp.float32)

    # depth -> cam rotation (x right, y down, z forward) and pinhole intrinsics
    Rt = jnp.broadcast_to(
        jnp.array([[1.0, 0.0, 0.0], [0.0, 0.0, -1.0], [0.0, 1.0, 0.0]], jnp.float32), (B, 3, 3))
    K = jnp.broadcast_to(
        jnp.array([[20.0, 0.0, W / 2.0], [0.0, 20.0, H / 2.0], [0.0, 0.0, 1.0]], jnp.float32),
        (B, 3, 3))

    lt = jax.random.uniform(k4, (B, bbox_num, 2), minval=2.0, maxval=20.0)
    wh = jax.random.uniform(k5, (B, bbox_num, 2), minval=8.0, maxval=24.0)
    conf = jax.random.uniform(k6, (B, bbox_num, 1), minval=0.05, maxval=0.95)
    cls = jax.random.randint(jax.random.PRNGKey(7), (B, bbox_num, 1), 0,
                             NUM_CLASSES).astype(jnp.float32)
    bboxes_2d = jnp.concatenate([lt, lt + wh, conf, cls], axis=-1)   # [l, t, r, b, conf, cls]

    imgs = jax.random.uniform(jax.random.PRNGKey(8), (B, 3, H, W), minval=0.0, maxval=255.0)

    feats, mask = vote_fusion(imgs, bboxes_2d, seeds_3d, Rt, K)
    jax.block_until_ready((feats, mask))
    assert feats.shape == (B, 18, MAX_IMVOTE_PER_PIXEL * N)
    assert mask.shape == (B, MAX_IMVOTE_PER_PIXEL * N)
    assert mask.dtype == jnp.bool_
    assert bool(jnp.all(jnp.isfinite(feats)))
    print("KERNEL_OK")
</pallas_src>

<mosaic_0001>
module attributes {stable_mosaic.version = 11 : i64} {
  func.func @_vote_fusion_kernel(%arg0: i32, %arg1: i32, %arg2: memref<1x16x256xf32, #tpu.memory_space<vmem>>, %arg3: memref<1x8x8xf32, #tpu.memory_space<vmem>>, %arg4: memref<1x16x8xf32, #tpu.memory_space<vmem>>, %arg5: memref<1x3x16x256xf32, #tpu.memory_space<vmem>>) attributes {dimension_semantics = [#tpu.dimension_semantics<parallel>, #tpu.dimension_semantics<parallel>], iteration_bounds = array<i64: 2, 1>, scalar_prefetch = 0 : i64, scratch_operands = 0 : i64, tpu.core_type = #tpu.core_type<tc>, window_params = [{transform_indices = @transform_0, window_bounds = array<i64: 1, 16, 256>}, {transform_indices = @transform_1, window_bounds = array<i64: 1, 8, 8>}, {transform_indices = @transform_2, window_bounds = array<i64: 1, 16, 8>}, {transform_indices = @transform_3, window_bounds = array<i64: 1, 3, 16, 256>}]} {
    %c0 = arith.constant 0 : index
    %c0_0 = arith.constant 0 : index
    %c0_1 = arith.constant 0 : index
    %0 = vector.load %arg3[%c0, %c0_0, %c0_1] : memref<1x8x8xf32, #tpu.memory_space<vmem>>, vector<1x8x1xf32>
    %1 = vector.shape_cast %0 : vector<1x8x1xf32> to vector<8x1xf32>
    %2 = vector.shape_cast %1 : vector<8x1xf32> to vector<8x1xf32>
    %3 = vector.broadcast %2 : vector<8x1xf32> to vector<8x128xf32>
    %c0_2 = arith.constant 0 : index
    %c0_3 = arith.constant 0 : index
    %c1 = arith.constant 1 : index
    %4 = vector.load %arg3[%c0_2, %c0_3, %c1] : memref<1x8x8xf32, #tpu.memory_space<vmem>>, vector<1x8x1xf32>
    %5 = vector.shape_cast %4 : vector<1x8x1xf32> to vector<8x1xf32>
    %6 = vector.shape_cast %5 : vector<8x1xf32> to vector<8x1xf32>
    %7 = vector.broadcast %6 : vector<8x1xf32> to vector<8x128xf32>
    %c0_4 = arith.constant 0 : index
    %c0_5 = arith.constant 0 : index
    %c2 = arith.constant 2 : index
    %8 = vector.load %arg3[%c0_4, %c0_5, %c2] : memref<1x8x8xf32, #tpu.memory_space<vmem>>, vector<1x8x1xf32>
    %9 = vector.shape_cast %8 : vector<1x8x1xf32> to vector<8x1xf32>
    %10 = vector.shape_cast %9 : vector<8x1xf32> to vector<8x1xf32>
    %11 = vector.broadcast %10 : vector<8x1xf32> to vector<8x128xf32>
    %c0_6 = arith.constant 0 : index
    %c0_7 = arith.constant 0 : index
    %c3 = arith.constant 3 : index
    %12 = vector.load %arg3[%c0_6, %c0_7, %c3] : memref<1x8x8xf32, #tpu.memory_space<vmem>>, vector<1x8x1xf32>
    %13 = vector.shape_cast %12 : vector<1x8x1xf32> to vector<8x1xf32>
    %14 = vector.shape_cast %13 : vector<8x1xf32> to vector<8x1xf32>
    %15 = vector.broadcast %14 : vector<8x1xf32> to vector<8x128xf32>
    %c0_8 = arith.constant 0 : index
    %c0_9 = arith.constant 0 : index
    %c4 = arith.constant 4 : index
    %16 = vector.load %arg3[%c0_8, %c0_9, %c4] : memref<1x8x8xf32, #tpu.memory_space<vmem>>, vector<1x8x1xf32>
    %17 = vector.shape_cast %16 : vector<1x8x1xf32> to vector<8x1xf32>
    %18 = vector.shape_cast %17 : vector<8x1xf32> to vector<8x1xf32>
    %19 = vector.broadcast %18 : vector<8x1xf32> to vector<8x128xf32>
    %c0_10 = arith.constant 0 : index
    %c0_11 = arith.constant 0 : index
    %c0_12 = arith.constant 0 : index
    %20 = vector.load %arg4[%c0_10, %c0_11, %c0_12] : memref<1x16x8xf32, #tpu.memory_space<vmem>>, vector<1x16x8xf32>
    %21 = vector.shape_cast %20 : vector<1x16x8xf32> to vector<16x8xf32>
    %22 = tpu.iota {dimensions = array<i32: 0>} : vector<8x128xi32>
    %c0_i32 = arith.constant 0 : i32
    %c2_i32 = arith.constant 2 : i32
    %23 = arith.addi %c0_i32, %c2_i32 : i32
    %c1_i32 = arith.constant 1 : i32
    scf.for %arg6 = %c0_i32 to %23 step %c1_i32  : i32 {
      %c1_i32_14 = arith.constant 1 : i32
      %24 = arith.muli %arg6, %c1_i32_14 : i32
      %c0_i32_15 = arith.constant 0 : i32
      %25 = arith.addi %c0_i32_15, %24 : i32
      %c128_i32 = arith.constant 128 : i32
      %26 = arith.muli %25, %c128_i32 : i32
      %27 = tpu.assume_multiple %26, 128 : i32
      %c0_16 = arith.constant 0 : index
      %c0_17 = arith.constant 0 : index
      %28 = arith.index_cast %27 : i32 to index
      %29 = vector.load %arg2[%c0_16, %c0_17, %28] : memref<1x16x256xf32, #tpu.memory_space<vmem>>, vector<1x1x128xf32>
      %30 = vector.shape_cast %29 : vector<1x1x128xf32> to vector<1x128xf32>
      %c0_18 = arith.constant 0 : index
      %c1_19 = arith.constant 1 : index
      %31 = arith.index_cast %27 : i32 to index
      %32 = vector.load %arg2[%c0_18, %c1_19, %31] : memref<1x16x256xf32, #tpu.memory_space<vmem>>, vector<1x1x128xf32>
      %33 = vector.shape_cast %32 : vector<1x1x128xf32> to vector<1x128xf32>
      %c0_20 = arith.constant 0 : index
      %c2_21 = arith.constant 2 : index
      %34 = arith.index_cast %27 : i32 to index
      %35 = vector.load %arg2[%c0_20, %c2_21, %34] : memref<1x16x256xf32, #tpu.memory_space<vmem>>, vector<1x1x128xf32>
      %36 = vector.shape_cast %35 : vector<1x1x128xf32> to vector<1x128xf32>
      %c0_22 = arith.constant 0 : index
      %c3_23 = arith.constant 3 : index
      %37 = arith.index_cast %27 : i32 to index
      %38 = vector.load %arg2[%c0_22, %c3_23, %37] : memref<1x16x256xf32, #tpu.memory_space<vmem>>, vector<1x1x128xf32>
      %39 = vector.shape_cast %38 : vector<1x1x128xf32> to vector<1x128xf32>
      %c0_24 = arith.constant 0 : index
      %c4_25 = arith.constant 4 : index
      %40 = arith.index_cast %27 : i32 to index
      %41 = vector.load %arg2[%c0_24, %c4_25, %40] : memref<1x16x256xf32, #tpu.memory_space<vmem>>, vector<1x1x128xf32>
      %42 = vector.shape_cast %41 : vector<1x1x128xf32> to vector<1x128xf32>
      %c0_26 = arith.constant 0 : index
      %c5 = arith.constant 5 : index
      %43 = arith.index_cast %27 : i32 to index
      %44 = vector.load %arg2[%c0_26, %c5, %43] : memref<1x16x256xf32, #tpu.memory_space<vmem>>, vector<1x1x128xf32>
      %45 = vector.shape_cast %44 : vector<1x1x128xf32> to vector<1x128xf32>
      %c0_27 = arith.constant 0 : index
      %c6 = arith.constant 6 : index
      %46 = arith.index_cast %27 : i32 to index
      %47 = vector.load %arg2[%c0_27, %c6, %46] : memref<1x16x256xf32, #tpu.memory_space<vmem>>, vector<1x1x128xf32>
      %48 = vector.shape_cast %47 : vector<1x1x128xf32> to vector<1x128xf32>
      %c0_28 = arith.constant 0 : index
      %c7 = arith.constant 7 : index
      %49 = arith.index_cast %27 : i32 to index
      %50 = vector.load %arg2[%c0_28, %c7, %49] : memref<1x16x256xf32, #tpu.memory_space<vmem>>, vector<1x1x128xf32>
      %51 = vector.shape_cast %50 : vector<1x1x128xf32> to vector<1x128xf32>
      %c0_29 = arith.constant 0 : index
      %c8 = arith.constant 8 : index
      %52 = arith.index_cast %27 : i32 to index
      %53 = vector.load %arg2[%c0_29, %c8, %52] : memref<1x16x256xf32, #tpu.memory_space<vmem>>, vector<1x1x128xf32>
      %54 = vector.shape_cast %53 : vector<1x1x128xf32> to vector<1x128xf32>
      %c0_30 = arith.constant 0 : index
      %c9 = arith.constant 9 : index
      %55 = arith.index_cast %27 : i32 to index
      %56 = vector.load %arg2[%c0_30, %c9, %55] : memref<1x16x256xf32, #tpu.memory_space<vmem>>, vector<1x1x128xf32>
      %57 = vector.shape_cast %56 : vector<1x1x128xf32> to vector<1x128xf32>
      %c0_31 = arith.constant 0 : index
      %c10 = arith.constant 10 : index
      %58 = arith.index_cast %27 : i32 to index
      %59 = vector.load %arg2[%c0_31, %c10, %58] : memref<1x16x256xf32, #tpu.memory_space<vmem>>, vector<1x1x128xf32>
      %60 = vector.shape_cast %59 : vector<1x1x128xf32> to vector<1x128xf32>
      %c0_32 = arith.constant 0 : index
      %c11 = arith.constant 11 : index
      %61 = arith.index_cast %27 : i32 to index
      %62 = vector.load %arg2[%c0_32, %c11, %61] : memref<1x16x256xf32, #tpu.memory_space<vmem>>, vector<1x1x128xf32>
      %63 = vector.shape_cast %62 : vector<1x1x128xf32> to vector<1x128xf32>
      %64 = vector.broadcast %30 : vector<1x128xf32> to vector<8x128xf32>
      %65 = arith.cmpf ogt, %64, %3 : vector<8x128xf32>
      %66 = vector.broadcast %30 : vector<1x128xf32> to vector<8x128xf32>
      %67 = arith.cmpf olt, %66, %11 : vector<8x128xf32>
      %68 = arith.andi %65, %67 : vector<8x128xi1>
      %69 = vector.broadcast %33 : vector<1x128xf32> to vector<8x128xf32>
      %70 = arith.cmpf ogt, %69, %7 : vector<8x128xf32>
      %71 = arith.andi %68, %70 : vector<8x128xi1>
      %72 = vector.broadcast %33 : vector<1x128xf32> to vector<8x128xf32>
      %73 = arith.cmpf olt, %72, %15 : vector<8x128xf32>
      %74 = arith.andi %71, %73 : vector<8x128xi1>
      %75 = arith.extui %74 : vector<8x128xi1> to vector<8x128xi32>
      %76 = arith.sitofp %75 : vector<8x128xi32> to vector<8x128xf32>
      %77 = arith.addf %76, %19 : vector<8x128xf32>
      %cst = arith.constant dense<0xFF800000> : vector<128xf32>
      %78 = vector.multi_reduction <maximumf>, %77, %cst [0] : vector<8x128xf32> to vector<128xf32>
      %79 = vector.shape_cast %78 : vector<128xf32> to vector<1x128xf32>
      %80 = vector.broadcast %79 : vector<1x128xf32> to vector<8x128xf32>
      %81 = arith.cmpf oeq, %77, %80 : vector<8x128xf32>
      %c8_i32 = arith.constant 8 : i32
      %82 = vector.broadcast %c8_i32 : i32 to vector<8x128xi32>
      %83 = arith.select %81, %22, %82 : vector<8x128xi1>, vector<8x128xi32>
      %cst_33 = arith.constant dense<2147483647> : vector<128xi32>
      %84 = vector.multi_reduction <minsi>, %83, %cst_33 [0] : vector<8x128xi32> to vector<128xi32>
      %85 = vector.shape_cast %84 : vector<128xi32> to vector<1x128xi32>
      %86 = vector.broadcast %85 : vector<1x128xi32> to vector<8x128xi32>
      %87 = arith.cmpi eq, %22, %86 : vector<8x128xi32>
      %cst_34 = arith.constant 0xFF800000 : f32
      %88 = vector.broadcast %cst_34 : f32 to vector<8x128xf32>
      %89 = arith.select %87, %88, %77 : vector<8x128xi1>, vector<8x128xf32>
      %cst_35 = arith.constant dense<0xFF800000> : vector<128xf32>
      %90 = vector.multi_reduction <maximumf>, %89, %cst_35 [0] : vector<8x128xf32> to vector<128xf32>
      %91 = vector.shape_cast %90 : vector<128xf32> to vector<1x128xf32>
      %92 = vector.broadcast %91 : vector<1x128xf32> to vector<8x128xf32>
      %93 = arith.cmpf oeq, %89, %92 : vector<8x128xf32>
      %c8_i32_36 = arith.constant 8 : i32
      %94 = vector.broadcast %c8_i32_36 : i32 to vector<8x128xi32>
      %95 = arith.select %93, %22, %94 : vector<8x128xi1>, vector<8x128xi32>
      %cst_37 = arith.constant dense<2147483647> : vector<128xi32>
      %96 = vector.multi_reduction <minsi>, %95, %cst_37 [0] : vector<8x128xi32> to vector<128xi32>
      %97 = vector.shape_cast %96 : vector<128xi32> to vector<1x128xi32>
      %98 = vector.broadcast %97 : vector<1x128xi32> to vector<8x128xi32>
      %99 = arith.cmpi eq, %22, %98 : vector<8x128xi32>
      %cst_38 = arith.constant 0xFF800000 : f32
      %100 = vector.broadcast %cst_38 : f32 to vector<8x128xf32>
      %101 = arith.select %99, %100, %89 : vector<8x128xi1>, vector<8x128xf32>
      %cst_39 = arith.constant dense<0xFF800000> : vector<128xf32>
      %102 = vector.multi_reduction <maximumf>, %101, %cst_39 [0] : vector<8x128xf32> to vector<128xf32>
      %103 = vector.shape_cast %102 : vector<128xf32> to vector<1x128xf32>
      %104 = vector.broadcast %103 : vector<1x128xf32> to vector<8x128xf32>
      %105 = arith.cmpf oeq, %101, %104 : vector<8x128xf32>
      %c8_i32_40 = arith.constant 8 : i32
      %106 = vector.broadcast %c8_i32_40 : i32 to vector<8x128xi32>
      %107 = arith.select %105, %22, %106 : vector<8x128xi1>, vector<8x128xi32>
      %cst_41 = arith.constant dense<2147483647> : vector<128xi32>
      %108 = vector.multi_reduction <minsi>, %107, %cst_41 [0] : vector<8x128xi32> to vector<128xi32>
      %109 = vector.shape_cast %108 : vector<128xi32> to vector<1x128xi32>
      %110 = vector.broadcast %109 : vector<1x128xi32> to vector<8x128xi32>
      %111 = arith.cmpi eq, %22, %110 : vector<8x128xi32>
      %112 = tpu.concatenate %87, %99, %111 in 1 : vector<8x128xi1>, vector<8x128xi1>, vector<8x128xi1> -> vector<8x384xi1>
      %113 = arith.extui %112 : vector<8x384xi1> to vector<8x384xi32>
      %114 = arith.sitofp %113 : vector<8x384xi32> to vector<8x384xf32>
      %cst_42 = arith.constant dense<0.000000e+00> : vector<16x384xf32>
      %115 = tpu.matmul %21, %114, %cst_42 {dimension_numbers = #tpu.dot_dimension_numbers<[1], [0], [0], [1], [0, 0, 1, 1], [], []>} : vector<16x8xf32>, vector<8x384xf32>, vector<16x384xf32> -> vector<16x384xf32>
      %116 = vector.extract_strided_slice %115 {offsets = [0, 0], sizes = [16, 128], strides = [1, 1]} : vector<16x384xf32> to vector<16x128xf32>
      %117 = vector.extract_strided_slice %116 {offsets = [0, 0], sizes = [1, 128], strides = [1, 1]} : vector<16x128xf32> to vector<1x128xf32>
      %118 = vector.extract_strided_slice %116 {offsets = [1, 0], sizes = [1, 128], strides = [1, 1]} : vector<16x128xf32> to vector<1x128xf32>
      %119 = vector.extract_strided_slice %116 {offsets = [2, 0], sizes = [1, 128], strides = [1, 1]} : vector<16x128xf32> to vector<1x128xf32>
      %120 = vector.extract_strided_slice %116 {offsets = [3, 0], sizes = [10, 128], strides = [1, 1]} : vector<16x128xf32> to vector<10x128xf32>
      %121 = arith.subf %79, %119 : vector<1x128xf32>
      %cst_43 = arith.constant 5.000000e-01 : f32
      %122 = vector.broadcast %cst_43 : f32 to vector<1x128xf32>
      %123 = arith.cmpf ogt, %121, %122 : vector<1x128xf32>
      %124 = arith.extui %123 : vector<1x128xi1> to vector<1x128xi32>
      %125 = arith.sitofp %124 : vector<1x128xi32> to vector<1x128xf32>
      %126 = arith.subf %117, %30 : vector<1x128xf32>
      %127 = arith.mulf %126, %36 : vector<1x128xf32>
      %128 = arith.subf %118, %33 : vector<1x128xf32>
      %129 = arith.mulf %128, %36 : vector<1x128xf32>
      %130 = arith.mulf %127, %48 : vector<1x128xf32>
      %131 = arith.addf %39, %130 : vector<1x128xf32>
      %132 = arith.mulf %129, %57 : vector<1x128xf32>
      %133 = arith.addf %131, %132 : vector<1x128xf32>
      %134 = arith.mulf %127, %51 : vector<1x128xf32>
      %135 = arith.addf %42, %134 : vector<1x128xf32>
      %136 = arith.mulf %129, %60 : vector<1x128xf32>
      %137 = arith.addf %135, %136 : vector<1x128xf32>
      %138 = arith.mulf %127, %54 : vector<1x128xf32>
      %139 = arith.addf %45, %138 : vector<1x128xf32>
      %140 = arith.mulf %129, %63 : vector<1x128xf32>
      %141 = arith.addf %139, %140 : vector<1x128xf32>
      %142 = arith.mulf %133, %133 : vector<1x128xf32>
      %143 = arith.mulf %137, %137 : vector<1x128xf32>
      %144 = arith.addf %142, %143 : vector<1x128xf32>
      %145 = arith.mulf %141, %141 : vector<1x128xf32>
      %146 = arith.addf %144, %145 : vector<1x128xf32>
      %cst_44 = arith.constant 9.99999997E-7 : f32
      %147 = vector.broadcast %cst_44 : f32 to vector<1x128xf32>
      %148 = arith.addf %146, %147 : vector<1x128xf32>
      %149 = math.sqrt %148 : vector<1x128xf32>
      %cst_45 = arith.constant 1.000000e+00 : f32
      %150 = vector.broadcast %cst_45 : f32 to vector<1x128xf32>
      %151 = arith.divf %150, %149 : vector<1x128xf32>
      %152 = arith.mulf %133, %151 : vector<1x128xf32>
      %153 = arith.mulf %137, %151 : vector<1x128xf32>
      %154 = arith.mulf %141, %151 : vector<1x128xf32>
      %cst_46 = arith.constant 9.99999997E-7 : f32
      %155 = vector.broadcast %cst_46 : f32 to vector<1x128xf32>
      %156 = arith.addf %153, %155 : vector<1x128xf32>
      %cst_47 = arith.constant 1.000000e+00 : f32
      %157 = vector.broadcast %cst_47 : f32 to vector<1x128xf32>
      %158 = arith.divf %157, %156 : vector<1x128xf32>
      %159 = arith.mulf %152, %158 : vector<1x128xf32>
      %160 = arith.mulf %159, %42 : vector<1x128xf32>
      %161 = arith.subf %160, %39 : vector<1x128xf32>
      %162 = arith.mulf %154, %158 : vector<1x128xf32>
      %163 = arith.mulf %162, %42 : vector<1x128xf32>
      %164 = arith.subf %163, %45 : vector<1x128xf32>
      %165 = arith.mulf %161, %125 : vector<1x128xf32>
      %166 = arith.mulf %164, %125 : vector<1x128xf32>
      %167 = arith.mulf %152, %125 : vector<1x128xf32>
      %168 = arith.mulf %153, %125 : vector<1x128xf32>
      %169 = arith.mulf %154, %125 : vector<1x128xf32>
      %170 = vector.broadcast %125 : vector<1x128xf32> to vector<10x128xf32>
      %171 = arith.mulf %120, %170 : vector<10x128xf32>
      %172 = tpu.concatenate %165, %166, %167, %168, %169, %171, %79 in 0 : vector<1x128xf32>, vector<1x128xf32>, vector<1x128xf32>, vector<1x128xf32>, vector<1x128xf32>, vector<10x128xf32>, vector<1x128xf32> -> vector<16x128xf32>
      %c0_48 = arith.constant 0 : index
      %c0_49 = arith.constant 0 : index
      %c0_50 = arith.constant 0 : index
      %173 = arith.index_cast %27 : i32 to index
      %174 = vector.load %arg5[%c0_48, %c0_49, %c0_50, %173] : memref<1x3x16x256xf32, #tpu.memory_space<vmem>>, vector<1x1x16x128xf32>
      %175 = vector.shape_cast %174 : vector<1x1x16x128xf32> to vector<16x128xf32>
      %176 = vector.shape_cast %172 : vector<16x128xf32> to vector<1x1x16x128xf32>
      tpu.vector_store %arg5[%c0_48, %c0_49, %c0_50, %173], %176 {strides = array<i32>} : memref<1x3x16x256xf32, #tpu.memory_space<vmem>>, vector<1x1x16x128xf32>,
      %177 = vector.extract_strided_slice %115 {offsets = [0, 128], sizes = [16, 128], strides = [1, 1]} : vector<16x384xf32> to vector<16x128xf32>
      %178 = vector.extract_strided_slice %177 {offsets = [0, 0], sizes = [1, 128], strides = [1, 1]} : vector<16x128xf32> to vector<1x128xf32>
      %179 = vector.extract_strided_slice %177 {offsets = [1, 0], sizes = [1, 128], strides = [1, 1]} : vector<16x128xf32> to vector<1x128xf32>
      %180 = vector.extract_strided_slice %177 {offsets = [2, 0], sizes = [1, 128], strides = [1, 1]} : vector<16x128xf32> to vector<1x128xf32>
      %181 = vector.extract_strided_slice %177 {offsets = [3, 0], sizes = [10, 128], strides = [1, 1]} : vector<16x128xf32> to vector<10x128xf32>
      %182 = arith.subf %91, %180 : vector<1x128xf32>
      %cst_51 = arith.constant 5.000000e-01 : f32
      %183 = vector.broadcast %cst_51 : f32 to vector<1x128xf32>
      %184 = arith.cmpf ogt, %182, %183 : vector<1x128xf32>
      %185 = arith.extui %184 : vector<1x128xi1> to vector<1x128xi32>
      %186 = arith.sitofp %185 : vector<1x128xi32> to vector<1x128xf32>
      %187 = arith.subf %178, %30 : vector<1x128xf32>
      %188 = arith.mulf %187, %36 : vector<1x128xf32>
      %189 = arith.subf %179, %33 : vector<1x128xf32>
      %190 = arith.mulf %189, %36 : vector<1x128xf32>
      %191 = arith.mulf %188, %48 : vector<1x128xf32>
      %192 = arith.addf %39, %191 : vector<1x128xf32>
      %193 = arith.mulf %190, %57 : vector<1x128xf32>
      %194 = arith.addf %192, %193 : vector<1x128xf32>
      %195 = arith.mulf %188, %51 : vector<1x128xf32>
      %196 = arith.addf %42, %195 : vector<1x128xf32>
      %197 = arith.mulf %190, %60 : vector<1x128xf32>
      %198 = arith.addf %196, %197 : vector<1x128xf32>
      %199 = arith.mulf %188, %54 : vector<1x128xf32>
      %200 = arith.addf %45, %199 : vector<1x128xf32>
      %201 = arith.mulf %190, %63 : vector<1x128xf32>
      %202 = arith.addf %200, %201 : vector<1x128xf32>
      %203 = arith.mulf %194, %194 : vector<1x128xf32>
      %204 = arith.mulf %198, %198 : vector<1x128xf32>
      %205 = arith.addf %203, %204 : vector<1x128xf32>
      %206 = arith.mulf %202, %202 : vector<1x128xf32>
      %207 = arith.addf %205, %206 : vector<1x128xf32>
      %cst_52 = arith.constant 9.99999997E-7 : f32
      %208 = vector.broadcast %cst_52 : f32 to vector<1x128xf32>
      %209 = arith.addf %207, %208 : vector<1x128xf32>
      %210 = math.sqrt %209 : vector<1x128xf32>
      %cst_53 = arith.constant 1.000000e+00 : f32
      %211 = vector.broadcast %cst_53 : f32 to vector<1x128xf32>
      %212 = arith.divf %211, %210 : vector<1x128xf32>
      %213 = arith.mulf %194, %212 : vector<1x128xf32>
      %214 = arith.mulf %198, %212 : vector<1x128xf32>
      %215 = arith.mulf %202, %212 : vector<1x128xf32>
      %cst_54 = arith.constant 9.99999997E-7 : f32
      %216 = vector.broadcast %cst_54 : f32 to vector<1x128xf32>
      %217 = arith.addf %214, %216 : vector<1x128xf32>
      %cst_55 = arith.constant 1.000000e+00 : f32
      %218 = vector.broadcast %cst_55 : f32 to vector<1x128xf32>
      %219 = arith.divf %218, %217 : vector<1x128xf32>
      %220 = arith.mulf %213, %219 : vector<1x128xf32>
      %221 = arith.mulf %220, %42 : vector<1x128xf32>
      %222 = arith.subf %221, %39 : vector<1x128xf32>
      %223 = arith.mulf %215, %219 : vector<1x128xf32>
      %224 = arith.mulf %223, %42 : vector<1x128xf32>
      %225 = arith.subf %224, %45 : vector<1x128xf32>
      %226 = arith.mulf %222, %186 : vector<1x128xf32>
      %227 = arith.mulf %225, %186 : vector<1x128xf32>
      %228 = arith.mulf %213, %186 : vector<1x128xf32>
      %229 = arith.mulf %214, %186 : vector<1x128xf32>
      %230 = arith.mulf %215, %186 : vector<1x128xf32>
      %231 = vector.broadcast %186 : vector<1x128xf32> to vector<10x128xf32>
      %232 = arith.mulf %181, %231 : vector<10x128xf32>
      %233 = tpu.concatenate %226, %227, %228, %229, %230, %232, %91 in 0 : vector<1x128xf32>, vector<1x128xf32>, vector<1x128xf32>, vector<1x128xf32>, vector<1x128xf32>, vector<10x128xf32>, vector<1x128xf32> -> vector<16x128xf32>
      %c0_56 = arith.constant 0 : index
      %c1_57 = arith.constant 1 : index
      %c0_58 = arith.constant 0 : index
      %234 = arith.index_cast %27 : i32 to index
      %235 = vector.load %arg5[%c0_56, %c1_57, %c0_58, %234] : memref<1x3x16x256xf32, #tpu.memory_space<vmem>>, vector<1x1x16x128xf32>
      %236 = vector.shape_cast %235 : vector<1x1x16x128xf32> to vector<16x128xf32>
      %237 = vector.shape_cast %233 : vector<16x128xf32> to vector<1x1x16x128xf32>
      tpu.vector_store %arg5[%c0_56, %c1_57, %c0_58, %234], %237 {strides = array<i32>} : memref<1x3x16x256xf32, #tpu.memory_space<vmem>>, vector<1x1x16x128xf32>,
      %238 = vector.extract_strided_slice %115 {offsets = [0, 256], sizes = [16, 128], strides = [1, 1]} : vector<16x384xf32> to vector<16x128xf32>
      %239 = vector.extract_strided_slice %238 {offsets = [0, 0], sizes = [1, 128], strides = [1, 1]} : vector<16x128xf32> to vector<1x128xf32>
      %240 = vector.extract_strided_slice %238 {offsets = [1, 0], sizes = [1, 128], strides = [1, 1]} : vector<16x128xf32> to vector<1x128xf32>
      %241 = vector.extract_strided_slice %238 {offsets = [2, 0], sizes = [1, 128], strides = [1, 1]} : vector<16x128xf32> to vector<1x128xf32>
      %242 = vector.extract_strided_slice %238 {offsets = [3, 0], sizes = [10, 128], strides = [1, 1]} : vector<16x128xf32> to vector<10x128xf32>
      %243 = arith.subf %103, %241 : vector<1x128xf32>
      %cst_59 = arith.constant 5.000000e-01 : f32
      %244 = vector.broadcast %cst_59 : f32 to vector<1x128xf32>
      %245 = arith.cmpf ogt, %243, %244 : vector<1x128xf32>
      %246 = arith.extui %245 : vector<1x128xi1> to vector<1x128xi32>
      %247 = arith.sitofp %246 : vector<1x128xi32> to vector<1x128xf32>
      %248 = arith.subf %239, %30 : vector<1x128xf32>
      %249 = arith.mulf %248, %36 : vector<1x128xf32>
      %250 = arith.subf %240, %33 : vector<1x128xf32>
      %251 = arith.mulf %250, %36 : vector<1x128xf32>
      %252 = arith.mulf %249, %48 : vector<1x128xf32>
      %253 = arith.addf %39, %252 : vector<1x128xf32>
      %254 = arith.mulf %251, %57 : vector<1x128xf32>
      %255 = arith.addf %253, %254 : vector<1x128xf32>
      %256 = arith.mulf %249, %51 : vector<1x128xf32>
      %257 = arith.addf %42, %256 : vector<1x128xf32>
      %258 = arith.mulf %251, %60 : vector<1x128xf32>
      %259 = arith.addf %257, %258 : vector<1x128xf32>
      %260 = arith.mulf %249, %54 : vector<1x128xf32>
      %261 = arith.addf %45, %260 : vector<1x128xf32>
      %262 = arith.mulf %251, %63 : vector<1x128xf32>
      %263 = arith.addf %261, %262 : vector<1x128xf32>
      %264 = arith.mulf %255, %255 : vector<1x128xf32>
      %265 = arith.mulf %259, %259 : vector<1x128xf32>
      %266 = arith.addf %264, %265 : vector<1x128xf32>
      %267 = arith.mulf %263, %263 : vector<1x128xf32>
      %268 = arith.addf %266, %267 : vector<1x128xf32>
      %cst_60 = arith.constant 9.99999997E-7 : f32
      %269 = vector.broadcast %cst_60 : f32 to vector<1x128xf32>
      %270 = arith.addf %268, %269 : vector<1x128xf32>
      %271 = math.sqrt %270 : vector<1x128xf32>
      %cst_61 = arith.constant 1.000000e+00 : f32
      %272 = vector.broadcast %cst_61 : f32 to vector<1x128xf32>
      %273 = arith.divf %272, %271 : vector<1x128xf32>
      %274 = arith.mulf %255, %273 : vector<1x128xf32>
      %275 = arith.mulf %259, %273 : vector<1x128xf32>
      %276 = arith.mulf %263, %273 : vector<1x128xf32>
      %cst_62 = arith.constant 9.99999997E-7 : f32
      %277 = vector.broadcast %cst_62 : f32 to vector<1x128xf32>
      %278 = arith.addf %275, %277 : vector<1x128xf32>
      %cst_63 = arith.constant 1.000000e+00 : f32
      %279 = vector.broadcast %cst_63 : f32 to vector<1x128xf32>
      %280 = arith.divf %279, %278 : vector<1x128xf32>
      %281 = arith.mulf %274, %280 : vector<1x128xf32>
      %282 = arith.mulf %281, %42 : vector<1x128xf32>
      %283 = arith.subf %282, %39 : vector<1x128xf32>
      %284 = arith.mulf %276, %280 : vector<1x128xf32>
      %285 = arith.mulf %284, %42 : vector<1x128xf32>
      %286 = arith.subf %285, %45 : vector<1x128xf32>
      %287 = arith.mulf %283, %247 : vector<1x128xf32>
      %288 = arith.mulf %286, %247 : vector<1x128xf32>
      %289 = arith.mulf %274, %247 : vector<1x128xf32>
      %290 = arith.mulf %275, %247 : vector<1x128xf32>
      %291 = arith.mulf %276, %247 : vector<1x128xf32>
      %292 = vector.broadcast %247 : vector<1x128xf32> to vector<10x128xf32>
      %293 = arith.mulf %242, %292 : vector<10x128xf32>
      %294 = tpu.concatenate %287, %288, %289, %290, %291, %293, %103 in 0 : vector<1x128xf32>, vector<1x128xf32>, vector<1x128xf32>, vector<1x128xf32>, vector<1x128xf32>, vector<10x128xf32>, vector<1x128xf32> -> vector<16x128xf32>
      %c0_64 = arith.constant 0 : index
      %c2_65 = arith.constant 2 : index
      %c0_66 = arith.constant 0 : index
      %295 = arith.index_cast %27 : i32 to index
      %296 = vector.load %arg5[%c0_64, %c2_65, %c0_66, %295] : memref<1x3x16x256xf32, #tpu.memory_space<vmem>>, vector<1x1x16x128xf32>
      %297 = vector.shape_cast %296 : vector<1x1x16x128xf32> to vector<16x128xf32>
      %298 = vector.shape_cast %294 : vector<16x128xf32> to vector<1x1x16x128xf32>
      tpu.vector_store %arg5[%c0_64, %c2_65, %c0_66, %295], %298 {strides = array<i32>} : memref<1x3x16x256xf32, #tpu.memory_space<vmem>>, vector<1x1x16x128xf32>,
    }
    %c2_i32_13 = arith.constant 2 : i32
    return
  }
  func.func @transform_0(%arg0: i32, %arg1: i32) -> (i32, i32, i32) {
    %c0_i32 = arith.constant 0 : i32
    %c0_i32_0 = arith.constant 0 : i32
    return %arg0, %c0_i32, %arg1 : i32, i32, i32
  }
  func.func @transform_1(%arg0: i32, %arg1: i32) -> (i32, i32, i32) {
    %c0_i32 = arith.constant 0 : i32
    %c0_i32_0 = arith.constant 0 : i32
    %c0_i32_1 = arith.constant 0 : i32
    return %arg0, %c0_i32, %c0_i32_0 : i32, i32, i32
  }
  func.func @transform_2(%arg0: i32, %arg1: i32) -> (i32, i32, i32) {
    %c0_i32 = arith.constant 0 : i32
    %c0_i32_0 = arith.constant 0 : i32
    %c0_i32_1 = arith.constant 0 : i32
    return %arg0, %c0_i32, %c0_i32_0 : i32, i32, i32
  }
  func.func @transform_3(%arg0: i32, %arg1: i32) -> (i32, i32, i32, i32) {
    %c0_i32 = arith.constant 0 : i32
    %c0_i32_0 = arith.constant 0 : i32
    %c0_i32_1 = arith.constant 0 : i32
    return %arg0, %c0_i32, %c0_i32_0, %arg1 : i32, i32, i32, i32
  }
}

</mosaic_0001>

<bundles_post_ra>
// kernel: tpu_custom_call.1
= control target key start
LH: loop header
LB: loop body
LE: loop exit
PB: predicated region body
PF: predicated region fallthrough
CT: control target
= control target key end

     0   :  { %8 = vsyncpa [#allocation3], 0  ;;  %s1776_s0 = inlined_call_operand.hbm [shape: f32[2,16,256], index: 0, kind: input, shape index: {}]   ;;  %s1777_s1 = inlined_call_operand.vmem [shape: f32[2,8,8], index: 1, kind: input, shape index: {}]   ;;  %s1778_s2 = inlined_call_operand.vmem [shape: f32[2,16,8], index: 2, kind: input, shape index: {}]   ;;  %s1779_s3 = inlined_call_operand.hbm [shape: f32[2,3,16,256], index: 3, kind: output, shape index: {}]  }
   0x1   :  { %10 = vsyncpa [#allocation3 + $0x1], 0 }
   0x2   :  { %11 = vsyncpa [#allocation4], 0 }
   0x3   :  { %13 = vsyncpa [#allocation4 + $0x1], 0  ;;  %s1283_s12 = smov 0   ;;  %s1285_s13 = smov 0  }
   0x4   :  { %s1287_s14 = smov 0   ;;  %s1289_s15 = smov 0  }
   0x5   :  { %s1291_s16 = smov 0   ;;  %s1293_s17 = smov 0  }
   0x6 LB: > { %s973_s18 = sadd.s32 4294967295, %s1244_s17   ;;  %s974_s19 = sadd.s32 4294967294, %s1244_s17   ;;  %s1244_s17 = sphi %s1293_s17, %s19_s17   ;;  %s1240_s16 = sphi %s1291_s16, %s1796_s16   ;;  %s1236_s15 = sphi %s1289_s15, %s1795_s15   ;;  %s1232_s14 = sphi %s1287_s14, %s1794_s14   ;;  %s1228_s13 = sphi %s1285_s13, %s1793_s13   ;;  %s1224_s12 = sphi %s1283_s12, %s1792_s12  }
   0x7   : > { %s31_s20 = sadd.s32 1, %s1240_s16  ;;  %s40_s21 = sadd.s32 1, %s1232_s14 }
   0x8   : > { %p33_p0 = scmp.ge.s32.totalorder %s31_s20, 2  ;;  %p47_p1 = scmp.ne.s32.totalorder %s1232_s14, %s1228_s13 }
   0x9   : > { %p48_p2 = scmp.eq.s32.totalorder %s1244_s17, 0  ;;  %p53_p3 = scmp.ne.s32.totalorder %s1228_s13, %s1224_s12 }
   0xa   : > { %s1798_s20 = smov (%p33_p0, %s31_s20), 0  ;;  %p54_p5 = scmp.eq.s32.totalorder %s973_s18, 0 }
   0xb   : > { %p1324_p4 = por %p48_p2, %p47_p1  ;;  %s35_s23 = ssub.s32 %s1240_s16, %s1798_s20 }
   0xc   : > { %p131_p6 = scmp.eq.s32.totalorder %s973_s18, 1  ;;  %p38_p7 = scmp.eq.s32.totalorder %s35_s23, 0 }
   0xd   : > { %p1330_p8 = por %p54_p5, %p53_p3  ;;  %p137_p10 = scmp.eq.s32.totalorder %s974_s19, 1 }
   0xe   : > { %p1334_p9 = por %p131_p6, %p47_p1  ;;  %p1035_p13 = scmp.lt.s32.totalorder %s1244_s17, 2 }
   0xf   : > { %s1339_s26 = scalar_select %p38_p7, %s1232_s14, %s40_s21  }
  0x10   : > { %s1783_s25 = scalar_select %p1334_p9, 1, 0 }
  0x11   : > { %p1341_p11 = por %p137_p10, %p53_p3  ;;  %s157_s28 = sand.u32 1, %s1232_s14  }
  0x12   : > { %s977_s29 = sshll.u32 %s157_s28, 5  ;;  %s1011_s30 = sshll.u32 %s1240_s16, 9 }
  0x13   : > { %s1784_s27 = scalar_select %p1341_p11, 1, 0 }
  0x14   : > { %s1352_s6 = scalar_lea.hbm %s1776_s0, %s1011_s30  ;;  %s161_s7 = scalar_lea.vmem [#allocation2], %s977_s29 }
  0x15   : > { %s170_s8 = sshll.u32 %s161_s7, 4  ;;  %p1358_p0 = pnand %p1035_p13, %p1324_p4  ;;  %s1354_s8 = int_to_ptr.vmem [resolvable:$true] %s170_s8 }
  0x16   : > { %s1363_s10 = scalar_lea.sflag [#allocation3], %s157_s28  ;;  %s1128_s11 = scalar_lea.hbm %s1352_s6, 512 }
  0x17   : > { %p1129_p2 = scmp.ne.s32.totalorder %s1352_s6, %s1128_s11  ;;  %p1130_p3 = pneg %p1358_p0 }
  0x18   : > { %s1133_s21 = scalar_lea.hbm %s1776_s0, 1024  ;;  %p1134_p4 = scmp.lt.u32.totalorder %s1352_s6, %s1776_s0 }
  0x19   : > { %p1131_p5 = pnand %p1130_p3, %p1129_p2  ;;  %p1135_p7 = scmp.lt.u32.totalorder %s1133_s21, %s1128_s11 }
  0x1a   : > { %p1137_p13 = scmp.lt.u32.totalorder %s1128_s11, %s1352_s6 }
  0x1b   : > { %p1132_p6 = pneg %p1131_p5  ;;  %p1136_p10 = por %p1135_p7, %p1134_p4 }
  0x1d   : > { %p1138_p12 = por %p1137_p13, %p1136_p10 }
  0x1f   : > { %p1139_p1 = pnand %p1138_p12, %p1132_p6 }
  0x21   : > { %1142 = shalt.err (!%p1139_p1)
}
  0x22   : > { %s1143_s28 = scalar_lea.vmem %s1354_s8, 512  ;;  %s1250_s29 = smov [#allocation2]  }
  0x23   : > { %p1144_p2 = scmp.ne.s32.totalorder %s1354_s8, %s1143_s28  ;;  %s1148_s30 = sshll.u32 %s1250_s29, 4  ;;  %s1149_s30 = int_to_ptr.vmem [resolvable:$false] %s1148_s30 }
  0x24   : > { %s1150_s4 = scalar_lea.vmem %s1149_s30, 1024  ;;  %p1151_p9 = scmp.lt.s32.totalorder %s1354_s8, %s1149_s30 }
  0x25   : > { %p1146_p5 = pnand %p1144_p2, %p1130_p3  ;;  %p1152_p4 = scmp.lt.s32.totalorder %s1150_s4, %s1143_s28 }
  0x27   : > { %p1147_p11 = pneg %p1146_p5  ;;  %p1153_p7 = por %p1152_p4, %p1151_p9 }
  0x29   : > { %p1154_p10 = pnand %p1153_p7, %p1147_p11 }
  0x2b   : > { %1157 = shalt.err (!%p1154_p10)
}
  0x2c   : > { %s1251_s5 = smov 256   ;;  %s1252_s7 = smov 16  }
  0x2d   : > { %1030 = dma.hbm_to_vmem [thread:$0]  (!%p1358_p0), %s1352_s6, 512, %s1354_s8, %s1363_s10, %s1251_s5, %s1251_s5, %s1252_s7  }
  0x2e   : > { %p193_p12 = scmp.lt.s32.totalorder %s1244_s17, 3  ;;  %p1786_p1 = scmp.ge.s32.totalorder %s1244_s17, 1 }
  0x30   : > { %p194_p3 = pnand %p1786_p1, %p193_p12 }
  0x31   : > { %s1395_s11 = sand.u32 (!%p194_p3), 1, %s1228_s13  }
  0x32   : > { %197 = sbr.rel (%p194_p3) target bundleno = 604 (0x25c), region = 32  ;;  %s981_s18 = sshll.u32 (!%p194_p3), %s1395_s11, 5 }
  0x33   : > { %s200_s19 = scalar_lea.sflag (!%p194_p3), [#allocation3], %s1395_s11  ;;  %s1399_s21 = scalar_lea.vmem (!%p194_p3), [#allocation2], %s981_s18 }
  0x39   : > { %1215 = dma.done.wait (%p1330_p8), %s200_s19, 512  }
  0x3a   : > { %1217 = vsyncadd (%p1330_p8), %s200_s19, 4294966784  ;;  %p236_p9 = scmp.lt.s32.totalorder %s1236_s15, 1  ;;  %v1253_v0 = vmov 2   ;;  %v1254_v1 = vmov 0   ;;  %v1255_v5 = vmov 3   ;;  %v1256_v6 = vmov 1  }
  0x3b   : > { %1106 = vset.pattern.permute.xlu1 %v1253_v0  ;;  %1104 = vset.pattern.permute.xlu0 %v1254_v1  ;;  %s1021_s30 = smul.u32 96, %s1395_s11  ;;  %v270_v7 = vlaneseq  ;;  %v1257_v8 = vmov 4   ;;  %s1432_s5 = smov 0  }
  0x3c   : > { %s237_s6 = scalar_select %p236_p9, %s1236_s15, 1 }
  0x3d   : > { %v1418_v9 = vshrl.u32 %v270_v7, 7  ;;  %s1430_s4 = scalar_lea.vmem [#allocation5], %s1021_s30 }
  0x3e   : > { %s982_s8 = sshll.u32 %s237_s6, 3  ;;  %s1012_s9 = sshll.u32 %s237_s6, 4 }
  0x3f   : > { %s239_s23 = scalar_lea.vmem %s1777_s1, %s982_s8  ;;  %s244_s24 = scalar_lea.vmem %s1778_s2, %s1012_s9 }
  0x40   : > { %v246_v2 = vld [vmem:[%s239_s23] sm:$0xff]  ;;  %v1415_v4 = vld [vmem:[%s244_s24 + $0x8] sm:$0xff] }
  0x41   : > { %v1413_v3 = vld [vmem:[%s244_s24] sm:$0xff]  ;;  %257 = vperm.xlu1 %1106, %v246_v2   ;;  %249 = vperm.xlu0 %1104, %v246_v2  }
  0x45   : > { %1107 = vset.pattern.permute.xlu1 %v1255_v5  ;;  %1105 = vset.pattern.permute.xlu0 %v1256_v6 }
  0x46   : > { %261 = vperm.xlu1 %1107, %v246_v2   ;;  %253 = vperm.xlu0 %1105, %v246_v2  }
  0x4a   : > { %1108 = vset.pattern.permute.xlu1 %v1257_v8  ;;  %1109 = vset.pattern.permute.xlu0 %v1257_v8 }
  0x4b   : > { %265 = vperm.xlu1 %1108, %v246_v2  }
  0xc0   : > { %v1420_v10 = vpop.permute.xlu1 %257  ;;  %v1422_v11 = vpop.permute.xlu0 %249 }
  0xc5   : > { %v1424_v12 = vpop.permute.xlu1 %261  ;;  %v1426_v13 = vpop.permute.xlu0 %253 }
  0xca   : > { %v1428_v14 = vpop.permute.xlu1 %265 }
  0xcb LB: >> { %vm367_vm0 = vcmask 64512   ;;  %v1258_v15 = vmov 0.0   ;;  %s985_s7 = sshll.u32 %s1248_s5, 7  ;;  %v1259_v48 = vmov 1.0   ;;  %s277_s5 = sadd.s32 1, %s1248_s5   ;;  %s1248_s5 = sphi %s1432_s5, %s277_s5  }
  0xcc   : >> { %438 = vmatprep.mubr.f32.mxu0 %v1258_v15  ;;  %1018 = vmatprep.mubr.msk.f32.mxu1 %vm367_vm0, %v1413_v3  ;;  %s1441_s18 = sshra.s32 %s985_s7, 7  ;;  %p274_p8 = scmp.ge.s32.totalorder %s277_s5, 2  }
  0xcd   : >> { %s986_s19 = sshll.u32 %s1441_s18, 3  ;;  %s1022_s9 = smul.u32 (%p274_p8), 1536, %s1236_s15 }
  0xce   : >> { %s1447_s6 = scalar_lea.vmem %s1399_s21, %s986_s19 [#allocation2]  ;;  %s1612_s8 = scalar_lea.vmem %s1430_s4, %s986_s19 [#allocation5] }
  0xcf   : >> { %v1450_v16 = vld [vmem:[%s1447_s6] ss:$0 sm:$0xff]  ;;  %v1453_v17 = vld [vmem:[%s1447_s6 + $0x1] ss:$0 sm:$0xff]  ;;  %v1492_v62 = vld [vmem:[%s1447_s6 + $0x2] ss:$0 sm:$0xff]  ;;  %s1725_s28 = scalar_lea.hbm (%p274_p8), %s1779_s3, %s1022_s9 }
  0xd0   : >> { %vm295_vm1 = vcmp.gt.f32.partialorder %v1450_v16, %v1422_v11  ;;  %vm296_vm2 = vcmp.lt.f32.partialorder %v1450_v16, %v1420_v10  ;;  %vm298_vm3 = vcmp.gt.f32.partialorder %v1453_v17, %v1426_v13  ;;  %vm300_vm4 = vcmp.lt.f32.partialorder %v1453_v17, %v1424_v12  ;;  %v1497_v0 = vld [vmem:[%s1447_s6 + $0x6] ss:$0 sm:$0xff]  ;;  %v1508_v7 = vld [vmem:[%s1447_s6 + $0x3] ss:$0 sm:$0xff]  ;;  %v1511_v8 = vld [vmem:[%s1447_s6 + $0x7] ss:$0 sm:$0xff] }
  0xd1   : >> { %vm297_vm5 = vmand %vm295_vm1, %vm296_vm2  ;;  %s847_s10 = sshll.u32 (%p274_p8), %s1430_s4, 4  ;;  %s832_s29 = scalar_lea.sflag (%p274_p8), [#allocation4], %s1395_s11  ;;  %s1727_s10 = int_to_ptr.vmem [resolvable:$true] %s847_s10 }
  0xd2   : >> { %vm299_vm6 = vmand %vm297_vm5, %vm298_vm3  ;;  %s1158_s24 = scalar_lea.vmem (%p274_p8), %s1727_s10, 1536  ;;  %p1789_p0 = scmp.ne.s32.totalorder (%p274_p8), %s1783_s25, 0 }
  0xd3   : >> { %vm301_vm7 = vmand %vm299_vm6, %vm300_vm4  ;;  %p1159_p11 = scmp.ne.s32.totalorder (%p274_p8), %s1727_s10, %s1158_s24  ;;  %s1260_s21 = smov (%p274_p8), [#allocation5]  }
  0xd4   : >> { %v987_v18 = vsel %vm301_vm7, 1.0, %v1258_v15  ;;  %s1162_s30 = sshll.u32 (%p274_p8), %s1260_s21, 4  ;;  %s1163_s30 = int_to_ptr.vmem [resolvable:$false] %s1162_s30 }
  0xd5   : >> { %v304_v19 = vadd.f32 %v987_v18, %v1428_v14  ;;  %v1514_v18 = vld [vmem:[%s1447_s6 + $0x11] ss:$0 sm:$0xff]  ;;  %p1160_p6 = pnand (%p274_p8), %p1159_p11, %p1789_p0  ;;  %s1164_s15 = scalar_lea.vmem (%p274_p8), %s1163_s30, 3072 }
  0xd6   : > { %p1165_p2 = scmp.lt.s32.totalorder (%p274_p8), %s1727_s10, %s1163_s30  ;;  %p1166_p5 = scmp.lt.s32.totalorder (%p274_p8), %s1164_s15, %s1158_s24 }
  0xd7   : >> { %v305_v20 = vrot.slane %v304_v19, 4  ;;  %p1161_p13 = pneg (%p274_p8), %p1160_p6 }
  0xd8   : > { %p1167_p4 = por (%p274_p8), %p1166_p5, %p1165_p2 }
  0xd9   : >> { %v306_v21 = vmax.f32 %v304_v19, %v305_v20 }
  0xda   : > { %p1168_p7 = pnand (%p274_p8), %p1167_p4, %p1161_p13 }
  0xdb   : >> { %v307_v22 = vrot.slane %v306_v21, 2 }
  0xdd   : >> { %v308_v23 = vmax.f32 %v306_v21, %v307_v22 }
  0xdf   : >> { %v309_v24 = vrot.slane %v308_v23, 1 }
  0xe1   : >> { %v1465_v25 = vmax.f32 %v308_v23, %v309_v24  ;;  %v1526_v23 = vld [vmem:[%s1447_s6 + $0x10] ss:$0 sm:$0xff]  ;;  %v1529_v24 = vld [vmem:[%s1447_s6 + $0x13] ss:$0 sm:$0xff] }
  0xe3   : >> { %vm311_vm8 = vcmp.eq.f32.partialorder %v304_v19, %v1465_v25 }
  0xe4   : >> { %v312_v26 = vsel %vm311_vm8, %v1418_v9, 8 }
  0xe5   : >> { %v313_v27 = vrot.slane %v312_v26, 4 }
  0xe7   : >> { %vm314_vm9 = vcmp.lt.s32.totalorder %v312_v26, %v313_v27 }
  0xe8   : >> { %v315_v28 = vsel %vm314_vm9, %v312_v26, %v313_v27  ;;  %vm610_vm9 = vcmask 1041408  }
  0xe9   : >> { %v316_v29 = vrot.slane %v315_v28, 2 }
  0xeb   : >> { %vm317_vm10 = vcmp.lt.s32.totalorder %v315_v28, %v316_v29 }
  0xec   : >> { %v318_v30 = vsel %vm317_vm10, %v315_v28, %v316_v29  ;;  %v1534_v28 = vsub.s32 2, %v1418_v9  ;;  %v1537_v29 = vld [vmem:[%s1447_s6 + $0x4] ss:$0 sm:$0xff]  ;;  %vm625_vm10 = vcmask 1046528  }
  0xed   : >> { %v319_v31 = vrot.slane %v318_v30, 1 }
  0xef   : >> { %vm320_vm11 = vcmp.lt.s32.totalorder %v318_v30, %v319_v31 }
  0xf0   : >> { %v321_v32 = vsel %vm320_vm11, %v318_v30, %v319_v31 }
  0xf1   : >> { %vm322_vm12 = vcmp.eq.s32.totalorder %v1418_v9, %v321_v32 }
  0xf2   : >> { %v323_v33 = vsel %vm322_vm12, -inf, %v304_v19  ;;  %v1517_v19 = vld [vmem:[%s1447_s6 + $0x12] ss:$0 sm:$0xff] }
  0xf3   : >> { %v324_v34 = vrot.slane %v323_v33, 4 }
  0xf5   : >> { %v325_v35 = vmax.f32 %v323_v33, %v324_v34 }
  0xf7   : >> { %v326_v36 = vrot.slane %v325_v35, 2 }
  0xf9   : >> { %v327_v37 = vmax.f32 %v325_v35, %v326_v36  ;;  %v1549_v35 = vld [vmem:[%s1447_s6 + $0x5] ss:$0 sm:$0xff] }
  0xfb   : >> { %v328_v38 = vrot.slane %v327_v37, 1 }
  0xfd   : >> { %v1472_v39 = vmax.f32 %v327_v37, %v328_v38 }
  0xff   : >> { %vm330_vm13 = vcmp.eq.f32.partialorder %v323_v33, %v1472_v39 }
 0x100   : >> { %v331_v40 = vsel %vm330_vm13, %v1418_v9, 8 }
 0x101   : >> { %v332_v41 = vrot.slane %v331_v40, 4 }
 0x103   : >> { %vm333_vm14 = vcmp.lt.s32.totalorder %v331_v40, %v332_v41 }
 0x104   : >> { %v334_v42 = vsel %vm333_vm14, %v331_v40, %v332_v41 }
 0x105   : >> { %v335_v43 = vrot.slane %v334_v42, 2 }
 0x107   : >> { %vm336_vm15 = vcmp.lt.s32.totalorder %v334_v42, %v335_v43 }
 0x108   : >> { %v337_v44 = vsel %vm336_vm15, %v334_v42, %v335_v43 }
 0x109   : >> { %v338_v45 = vrot.slane %v337_v44, 1 }
 0x10b   : >> { %vm339_vm1 = vcmp.lt.s32.totalorder %v337_v44, %v338_v45 }
 0x10c   : >> { %v340_v46 = vsel %vm339_vm1, %v337_v44, %v338_v45 }
 0x10d   : >> { %vm341_vm2 = vcmp.eq.s32.totalorder %v1418_v9, %v340_v46 }
 0x10e   : >> { %v342_v47 = vsel %vm341_vm2, -inf, %v323_v33  ;;  %991 = vmatprep.subr.msk.mxu0 %vm341_vm2, %v1259_v48 }
 0x10f   : >> { %v343_v49 = vrot.slane %v342_v47, 4  ;;  %992 = vmatpush1.msk.msra.mxu0 %vm322_vm12, %v1259_v48 }
 0x110   : >> { %993 = vmatmul.mubr.msk.f32.vlgmr.msra.gmra.mrb[0].mxu0 %vm367_vm0, %v1413_v3 }
 0x111   : >> { %v344_v50 = vmax.f32 %v342_v47, %v343_v49  ;;  %444 = vmatprep.mubr.f32.mxu0 %v1258_v15 }
 0x113   : >> { %v345_v51 = vrot.slane %v344_v50, 2 }
 0x114   : >> { %994 = vmatmul.mubr.msk.f32.gmra.mrb[2].mxu0 %vm367_vm0, %v1415_v4 }
 0x115   : >> { %v346_v52 = vmax.f32 %v344_v50, %v345_v51 }
 0x117   : >> { %v347_v53 = vrot.slane %v346_v52, 1 }
 0x119   : >> { %v1484_v54 = vmax.f32 %v346_v52, %v347_v53 }
 0x11b   : >> { %vm349_vm3 = vcmp.eq.f32.partialorder %v342_v47, %v1484_v54 }
 0x11c   : >> { %v350_v55 = vsel %vm349_vm3, %v1418_v9, 8  ;;  %vm616_vm3 = vcmask 1040384  }
 0x11d   : >> { %v351_v56 = vrot.slane %v350_v55, 4 }
 0x11f   : >> { %vm352_vm4 = vcmp.lt.s32.totalorder %v350_v55, %v351_v56 }
 0x120   : >> { %v353_v57 = vsel %vm352_vm4, %v350_v55, %v351_v56  ;;  %vm619_vm4 = vcmask 1042432  }
 0x121   : >> { %v354_v58 = vrot.slane %v353_v57, 2 }
 0x123   : >> { %vm355_vm5 = vcmp.lt.s32.totalorder %v353_v57, %v354_v58 }
 0x124   : >> { %v356_v59 = vsel %vm355_vm5, %v353_v57, %v354_v58  ;;  %vm621_vm5 = vcmask 1043456  }
 0x125   : >> { %v357_v60 = vrot.slane %v356_v59, 1 }
 0x127   : >> { %vm358_vm6 = vcmp.lt.s32.totalorder %v356_v59, %v357_v60 }
 0x128   : >> { %v359_v61 = vsel %vm358_vm6, %v356_v59, %v357_v60  ;;  %vm623_vm6 = vcmask 1044480  }
 0x129   : >> { %vm360_vm7 = vcmp.eq.s32.totalorder %v1418_v9, %v359_v61 }
 0x12a   : >> { %1016 = vmatprep.subr.msk.mxu1 %vm360_vm7, %v1259_v48 }
 0x12b   : >> { %1017 = vmatpush3.msk.msra.mxu1 %vm360_vm7, %v1259_v48 }
 0x12c   : >> { %1019 = vmatmul.mubr.msk.f32.vlgmr.msra.gmra.mrb[0].mxu1 %vm367_vm0, %v1415_v4 }
 0x1e3   : >> { %v1494_v63 = vpop.f32.mrb[0].mxu0 }
 0x1e4   : >> { %v530_v1 = vsub.f32 %v1494_v63, %v1450_v16  ;;  %v532_v2 = vsub.f32 %v1494_v63, %v1453_v17  ;;  %v1503_v5 = vpop.f32.mrb[1].mxu0  ;;  %v526_v6 = vsub.f32 %v1465_v25, %v1494_v63 }
 0x1e5   : >> { %v635_v20 = vsub.f32 %v1503_v5, %v1450_v16  ;;  %v637_v21 = vsub.f32 %v1503_v5, %v1453_v17  ;;  %v631_v22 = vsub.f32 %v1472_v39, %v1503_v5 }
 0x1e6   : >> { %v531_v26 = vmul.f32 %v530_v1, %v1492_v62  ;;  %v533_v27 = vmul.f32 %v532_v2, %v1492_v62  ;;  %vm527_vm0 = vcmp.gt.f32.partialorder %v526_v6, 0.5 }
 0x1e7   : >> { %v636_v30 = vmul.f32 %v635_v20, %v1492_v62  ;;  %v638_v31 = vmul.f32 %v637_v21, %v1492_v62  ;;  %v446_v32 = vpop.f32.mrb[2].mxu0  ;;  %v1542_v33 = vsel %vm527_vm0, 1.0, %v1258_v15  ;;  %vm1544_vm8 = vcmp.gt.f32.partialorder %v631_v22, 0.5 }
 0x1e8   : >> { %v534_v36 = vmul.f32 %v531_v26, %v1497_v0  ;;  %v536_v37 = vmul.f32 %v533_v27, %v1514_v18  ;;  %v541_v38 = vmul.f32 %v531_v26, %v1511_v8  ;;  %v543_v40 = vmul.f32 %v533_v27, %v1517_v19  ;;  %v448_v41 = vpop.f32.mrb[3].mxu0 }
 0x1e9   : >> { %v548_v42 = vmul.f32 %v531_v26, %v1526_v23  ;;  %v550_v43 = vmul.f32 %v533_v27, %v1529_v24  ;;  %v639_v44 = vmul.f32 %v636_v30, %v1497_v0  ;;  %v641_v45 = vmul.f32 %v638_v31, %v1514_v18 }
 0x1ea   : >> { %v535_v46 = vadd.f32 %v534_v36, %v1508_v7  ;;  %v538_v47 = vrot.slane %v536_v37, 1  ;;  %v542_v48 = vadd.f32 %v541_v38, %v1537_v29  ;;  %v545_v49 = vrot.slane %v543_v40, 1 }
 0x1eb   : >> { %v549_v50 = vadd.f32 %v548_v42, %v1549_v35  ;;  %v552_v51 = vrot.slane %v550_v43, 1  ;;  %v640_v52 = vadd.f32 %v639_v44, %v1508_v7  ;;  %v643_v53 = vrot.slane %v641_v45, 1 }
 0x1ec   : >> { %v1563_v55 = vadd.f32 %v538_v47, %v535_v46  ;;  %v1565_v56 = vadd.f32 %v545_v49, %v542_v48  ;;  %v646_v57 = vmul.f32 %v636_v30, %v1511_v8  ;;  %v648_v58 = vmul.f32 %v638_v31, %v1517_v19 }
 0x1ed   : >> { %v1569_v59 = vadd.f32 %v552_v51, %v549_v50  ;;  %v1571_v60 = vadd.f32 %v643_v53, %v640_v52  ;;  %v653_v61 = vmul.f32 %v636_v30, %v1526_v23  ;;  %v655_v1 = vmul.f32 %v638_v31, %v1529_v24 }
 0x1ee   : >> { %v555_v2 = vmul.f32 %v1563_v55, %v1563_v55  ;;  %v556_v6 = vmul.f32 %v1565_v56, %v1565_v56  ;;  %v647_v20 = vadd.f32 %v646_v57, %v1537_v29  ;;  %v650_v21 = vrot.slane %v648_v58, 1 }
 0x1ef   : >> { %v558_v22 = vmul.f32 %v1569_v59, %v1569_v59  ;;  %v654_v26 = vadd.f32 %v653_v61, %v1549_v35  ;;  %v657_v27 = vrot.slane %v655_v1, 1  ;;  %v660_v30 = vmul.f32 %v1571_v60, %v1571_v60 }
 0x1f0   : >> { %v557_v36 = vadd.f32 %v556_v6, %v555_v2  ;;  %v1583_v37 = vadd.f32 %v650_v21, %v647_v20  ;;  %v593_v31 = vrot.slane %v1542_v33, %v1534_v28  ;;  %v1594_v40 = vsel %vm1544_vm8, 1.0, %v1258_v15 }
 0x1f1   : >> { %v1589_v38 = vadd.f32 %v657_v27, %v654_v26  ;;  %v698_v47 = vrot.slane %v1594_v40, %v1534_v28 }
 0x1f2   : >> { %v559_v42 = vadd.f32 %v558_v22, %v557_v36  ;;  %v661_v43 = vmul.f32 %v1583_v37, %v1583_v37  ;;  %v1599_v44 = vmul.f32 %v593_v31, %v1494_v63  ;;  %v595_v45 = vmul.f32 %v593_v31, %v446_v32 }
 0x1f3   : >> { %v663_v46 = vmul.f32 %v1589_v38, %v1589_v38  ;;  %v1607_v51 = vmul.f32 %v698_v47, %v1503_v5  ;;  %v700_v52 = vmul.f32 %v698_v47, %v448_v41 }
 0x1f4   : >> { %v560_v34 = vadd.f32 1e-06, %v559_v42  ;;  %v662_v48 = vadd.f32 %v661_v43, %v660_v30  ;;  %v611_v49 = vrot.slane %v1599_v44, 6  ;;  %v612_v50 = vrot.slane %v595_v45, 6 }
 0x1f5   : >> { %v715_v53 = vrot.slane %v1607_v51, 6  ;;  %v716_v57 = vrot.slane %v700_v52, 6 }
 0x1f6   : >> { %1110 = vrsqrt.f32 %v560_v34  ;;  %v664_v63 = vadd.f32 %v663_v46, %v662_v48  ;;  %v613_v32 = vsel %vm610_vm9, %v611_v49, %v612_v50  ;;  %vm563_vm11 = vcmp.eq.f32.partialorder %v560_v34, inf }
 0x1f7   : >> { %v626_v58 = vsel %vm625_vm10, %v613_v32, %v1465_v25  ;;  %v717_v41 = vsel %vm610_vm9, %v715_v53, %v716_v57  ;;  %vm565_vm12 = vcmp.eq.f32.partialorder %v560_v34, 0.0  ;;  %v566_v6 = vand.u32 2147483648, %v560_v34 }
 0x1f8   : >> { %v665_v5 = vadd.f32 1e-06, %v664_v63  ;;  %630 = vst [vmem:[%s1612_s8 + $0x10] sm:$0xff] %v626_v58  ;;  %v725_v61 = vsel %vm625_vm10, %v717_v41, %v1472_v39 }
 0x1f9   : >> { %1003 = vst [vmem:[%s1612_s8 + $0x30] sm:$0xff] %v725_v61 }
 0x1fa   : >> { %1112 = vrsqrt.f32 %v665_v5  ;;  %vm668_vm13 = vcmp.eq.f32.partialorder %v665_v5, inf  ;;  %vm670_vm15 = vcmp.eq.f32.partialorder %v665_v5, 0.0  ;;  %v671_v31 = vand.u32 2147483648, %v665_v5 }
 0x1ff   : >> { %v1020_v1 = vpop.f32.mrb[0].mxu1 }
 0x200   : >> { %v1111_v2 = vpop.eup %1110  ;;  %v517_v20 = vpop.f32.mrb[1].mxu1 }
 0x201   : >> { %v562_v21 = vmul.f32 %v1111_v2, %v560_v34  ;;  %v731_v25 = vsub.f32 %v1484_v54, %v517_v20  ;;  %v735_v22 = vsub.f32 %v517_v20, %v1450_v16  ;;  %v737_v26 = vsub.f32 %v517_v20, %v1453_v17 }
 0x203   : >> { %v564_v27 = vsel %vm563_vm11, %v560_v34, %v562_v21  ;;  %vm732_vm14 = vcmp.gt.f32.partialorder %v731_v25, 0.5  ;;  %v736_v39 = vmul.f32 %v735_v22, %v1492_v62  ;;  %v738_v36 = vmul.f32 %v737_v26, %v1492_v62 }
 0x204   : >> { %v567_v30 = vsel %vm565_vm12, %v566_v6, %v564_v27  ;;  %v1633_v42 = vsel %vm732_vm14, 1.0, %v1258_v15  ;;  %v1113_v43 = vpop.eup %1112  ;;  %v583_v25 = vrot.slane %v1542_v33, 2 }
 0x205   : >> { %1114 = vrcp.f32 %v567_v30  ;;  %v739_v45 = vmul.f32 %v736_v39, %v1497_v0  ;;  %v741_v16 = vmul.f32 %v738_v36, %v1514_v18  ;;  %v746_v17 = vmul.f32 %v736_v39, %v1511_v8 }
 0x206   : >> { %v667_v46 = vmul.f32 %v1113_v43, %v665_v5  ;;  %v748_v47 = vmul.f32 %v738_v36, %v1517_v19  ;;  %v753_v34 = vmul.f32 %v736_v39, %v1526_v23  ;;  %v755_v62 = vmul.f32 %v738_v36, %v1529_v24 }
 0x207   : >> { %v740_v48 = vadd.f32 %v739_v45, %v1508_v7  ;;  %v743_v50 = vrot.slane %v741_v16, 1  ;;  %v747_v15 = vadd.f32 %v746_v17, %v1537_v29  ;;  %v798_v19 = vrot.slane %v1633_v42, %v1534_v28 }
 0x208   : >> { %v669_v52 = vsel %vm668_vm13, %v665_v5, %v667_v46  ;;  %v750_v63 = vrot.slane %v748_v47, 1  ;;  %v754_v0 = vadd.f32 %v753_v34, %v1549_v35  ;;  %v757_v18 = vrot.slane %v755_v62, 1 }
 0x209   : >> { %v672_v8 = vsel %vm670_vm15, %v671_v31, %v669_v52  ;;  %v1646_v32 = vadd.f32 %v743_v50, %v740_v48  ;;  %v1656_v58 = vmul.f32 %v798_v19, %v517_v20  ;;  %v800_v41 = vmul.f32 %v1020_v1, %v798_v19 }
 0x20a   : >> { %1116 = vrcp.f32 %v672_v8  ;;  %v1650_v23 = vadd.f32 %v750_v63, %v747_v15  ;;  %v1652_v24 = vadd.f32 %v757_v18, %v754_v0  ;;  %v688_v16 = vrot.slane %v1594_v40, 2 }
 0x20b   : >> { %v760_v57 = vmul.f32 %v1646_v32, %v1646_v32  ;;  %v815_v61 = vrot.slane %v1656_v58, 6  ;;  %v816_v2 = vrot.slane %v800_v41, 6 }
 0x20c   : >> { %v761_v5 = vmul.f32 %v1650_v23, %v1650_v23  ;;  %v763_v28 = vmul.f32 %v1652_v24, %v1652_v24 }
 0x20d   : >> { %v817_v20 = vsel %vm610_vm9, %v815_v61, %v816_v2 }
 0x20e   : >> { %v762_v6 = vadd.f32 %v761_v5, %v760_v57  ;;  %v825_v39 = vsel %vm625_vm10, %v817_v20, %v1484_v54 }
 0x20f   : >> { %v1115_v21 = vpop.eup %1114  ;;  %1007 = vst [vmem:[%s1612_s8 + $0x50] sm:$0xff] %v825_v39 }
 0x210   : >> { %v570_v1 = vmul.f32 %v1115_v21, %v1563_v55  ;;  %v571_v22 = vmul.f32 %v1115_v21, %v1565_v56  ;;  %v572_v26 = vmul.f32 %v1115_v21, %v1569_v59  ;;  %v764_v27 = vadd.f32 %v763_v28, %v762_v6 }
 0x212   : >> { %v573_v36 = vadd.f32 1e-06, %v571_v22  ;;  %v587_v30 = vmul.f32 %v583_v25, %v570_v1  ;;  %v588_v31 = vmul.f32 %v583_v25, %v571_v22  ;;  %v589_v43 = vmul.f32 %v583_v25, %v572_v26 }
 0x213   : >> { %v765_v33 = vadd.f32 1e-06, %v764_v27 }
 0x214   : >> { %v1117_v45 = vpop.eup %1116  ;;  %1118 = vrcp.f32 %v573_v36  ;;  %v600_v28 = vrot.slane %v587_v30, 6 }
 0x215   : >> { %v675_v55 = vmul.f32 %v1117_v45, %v1571_v60  ;;  %v676_v56 = vmul.f32 %v1117_v45, %v1583_v37  ;;  %v677_v59 = vmul.f32 %v1117_v45, %v1589_v38  ;;  %1120 = vrsqrt.f32 %v765_v33 }
 0x216   : >> { %vm768_vm1 = vcmp.eq.f32.partialorder %v765_v33, inf  ;;  %v771_v60 = vand.u32 2147483648, %v765_v33  ;;  %vm770_vm2 = vcmp.eq.f32.partialorder %v765_v33, 0.0 }
 0x217   : >> { %v678_v17 = vadd.f32 1e-06, %v676_v56  ;;  %v692_v46 = vmul.f32 %v688_v16, %v675_v55  ;;  %v693_v54 = vmul.f32 %v688_v16, %v676_v56  ;;  %v694_v47 = vmul.f32 %v688_v16, %v677_v59 }
 0x219   : >> { %1122 = vrcp.f32 %v678_v17  ;;  %v708_v56 = vrot.slane %v693_v54, 5  ;;  %v788_v17 = vrot.slane %v1633_v42, 2 }
 0x21e   : >> { %v1119_v34 = vpop.eup %1118 }
 0x21f   : >> { %v1121_v62 = vpop.eup %1120  ;;  %v576_v48 = vmul.f32 %v1119_v34, %v570_v1  ;;  %v579_v50 = vmul.f32 %v1119_v34, %v572_v26  ;;  %v603_v1 = vrot.slane %v588_v31, 5  ;;  %v606_v26 = vrot.slane %v589_v43, 4 }
 0x220   : >> { %v767_v15 = vmul.f32 %v1121_v62, %v765_v33 }
 0x221   : >> { %v577_v52 = vmul.f32 %v576_v48, %v1537_v29  ;;  %v580_v40 = vmul.f32 %v579_v50, %v1537_v29 }
 0x222   : >> { %v769_v37 = vsel %vm768_vm1, %v765_v33, %v767_v15 }
 0x223   : >> { %v1123_v38 = vpop.eup %1122  ;;  %v578_v63 = vsub.f32 %v577_v52, %v1508_v7  ;;  %v581_v0 = vsub.f32 %v580_v40, %v1549_v35  ;;  %v772_v18 = vsel %vm770_vm2, %v771_v60, %v769_v37 }
 0x224   : >> { %v681_v8 = vmul.f32 %v1123_v38, %v675_v55  ;;  %v684_v19 = vmul.f32 %v1123_v38, %v677_v59  ;;  %1124 = vrcp.f32 %v772_v18  ;;  %v705_v55 = vrot.slane %v692_v46, 6 }
 0x225   : >> { %v585_v57 = vmul.f32 %v583_v25, %v578_v63  ;;  %v586_v41 = vmul.f32 %v583_v25, %v581_v0  ;;  %v711_v59 = vrot.slane %v694_v47, 4 }
 0x226   : >> { %v682_v5 = vmul.f32 %v681_v8, %v1537_v29  ;;  %v685_v2 = vmul.f32 %v684_v19, %v1537_v29 }
 0x227   : >> { %v597_v6 = vrot.slane %v586_v41, 7 }
 0x228   : >> { %v683_v21 = vsub.f32 %v682_v5, %v1508_v7  ;;  %v686_v20 = vsub.f32 %v685_v2, %v1549_v35 }
 0x229   : >> { %v617_v22 = vsel %vm616_vm3, %v585_v57, %v597_v6 }
 0x22a   : >> { %v618_v25 = vsel %vm610_vm9, %v617_v22, %v600_v28  ;;  %v690_v27 = vmul.f32 %v688_v16, %v683_v21  ;;  %v691_v39 = vmul.f32 %v688_v16, %v686_v20 }
 0x22b   : >> { %v620_v36 = vsel %vm619_vm4, %v618_v25, %v603_v1 }
 0x22c   : >> { %v622_v30 = vsel %vm621_vm5, %v620_v36, %v606_v26  ;;  %v702_v33 = vrot.slane %v691_v39, 7 }
 0x22d   : >> { %v624_v45 = vsel %vm623_vm6, %v622_v30, %v611_v49 }
 0x22e   : >> { %v1125_v31 = vpop.eup %1124  ;;  %629 = vst [vmem:[%s1612_s8] sm:$0xff] %v624_v45  ;;  %v720_v43 = vsel %vm616_vm3, %v690_v27, %v702_v33 }
 0x22f   : >> { %v721_v16 = vsel %vm610_vm9, %v720_v43, %v705_v55  ;;  %v775_v34 = vmul.f32 %v1125_v31, %v1646_v32  ;;  %v776_v62 = vmul.f32 %v1125_v31, %v1650_v23  ;;  %v777_v44 = vmul.f32 %v1125_v31, %v1652_v24 }
 0x230   : >> { %v722_v49 = vsel %vm619_vm4, %v721_v16, %v708_v56 }
 0x231   : >> { %v723_v46 = vsel %vm621_vm5, %v722_v49, %v711_v59  ;;  %v778_v48 = vadd.f32 1e-06, %v776_v62  ;;  %v792_v50 = vmul.f32 %v788_v17, %v775_v34  ;;  %v793_v54 = vmul.f32 %v788_v17, %v776_v62 }
 0x232   : >> { %v724_v47 = vsel %vm623_vm6, %v723_v46, %v715_v53  ;;  %v794_v42 = vmul.f32 %v788_v17, %v777_v44 }
 0x233   : >> { %1002 = vst [vmem:[%s1612_s8 + $0x20] sm:$0xff] %v724_v47  ;;  %1126 = vrcp.f32 %v778_v48  ;;  %v805_v63 = vrot.slane %v792_v50, 6  ;;  %v808_v53 = vrot.slane %v793_v54, 5 }
 0x234   : >> { %v811_v18 = vrot.slane %v794_v42, 4 }
 0x23d   : >> { %v1127_v15 = vpop.eup %1126 }
 0x23e   : >> { %v781_v32 = vmul.f32 %v1127_v15, %v775_v34  ;;  %v784_v52 = vmul.f32 %v1127_v15, %v777_v44 }
 0x240   : >> { %v782_v23 = vmul.f32 %v781_v32, %v1537_v29  ;;  %v785_v24 = vmul.f32 %v784_v52, %v1537_v29 }
 0x242   : >> { %v783_v40 = vsub.f32 %v782_v23, %v1508_v7  ;;  %v786_v60 = vsub.f32 %v785_v24, %v1549_v35 }
 0x244   : >> { %v790_v37 = vmul.f32 %v788_v17, %v783_v40  ;;  %v791_v38 = vmul.f32 %v788_v17, %v786_v60 }
 0x246   : >> { %v802_v51 = vrot.slane %v791_v38, 7 }
 0x247   : > { %276 = sbr.rel (!%p274_p8) target bundleno = 203 (0xcb), region = 94 }
 0x248   : >> { %v820_v0 = vsel %vm616_vm3, %v790_v37, %v802_v51 }
 0x249   : >> { %v821_v8 = vsel %vm610_vm9, %v820_v0, %v805_v63 }
 0x24a   : >> { %v822_v19 = vsel %vm619_vm4, %v821_v8, %v808_v53 }
 0x24b   : >> { %v823_v57 = vsel %vm621_vm5, %v822_v19, %v811_v18 }
 0x24c   : >> { %v824_v7 = vsel %vm623_vm6, %v823_v57, %v815_v61 }
 0x24d   : >> { %1006 = vst [vmem:[%s1612_s8 + $0x40] sm:$0xff] %v824_v7 }
 0x24e   : > { %1171 = shalt.err (!%p1168_p7)
}
 0x24f   : > { %s1172_s4 = scalar_lea.hbm %s1725_s28, 1536  ;;  %s1176_s18 = scalar_lea.hbm %s1779_s3, 3072 }
 0x250   : > { %p1173_p10 = scmp.ne.s32.totalorder %s1725_s28, %s1172_s4  ;;  %p1177_p3 = scmp.lt.u32.totalorder %s1725_s28, %s1779_s3 }
 0x251   : > { %p1178_p9 = scmp.lt.u32.totalorder %s1176_s18, %s1172_s4  ;;  %p1180_p11 = scmp.lt.u32.totalorder %s1172_s4, %s1725_s28 }
 0x252   : > { %p1174_p12 = pnand %p1173_p10, %p1789_p0 }
 0x253   : > { %p1179_p8 = por %p1178_p9, %p1177_p3 }
 0x254   : > { %p1175_p1 = pneg %p1174_p12 }
 0x255   : > { %p1181_p6 = por %p1180_p11, %p1179_p8 }
 0x257   : > { %p1182_p13 = pnand %p1181_p6, %p1175_p1 }
 0x259   : > { %1185 = shalt.err (!%p1182_p13)
}
 0x25a   : > { %s1261_s8 = smov 256   ;;  %s1262_s9 = smov 16  }
 0x25b   : > { %1025 = dma.vmem_to_hbm [thread:$0]  (%p1789_p0), %s1727_s10, 1536, %s1725_s28, %s832_s29, %s1261_s8, %s1261_s8, %s1262_s9  }
 0x25c PF: > { %s862_s22 = sand.u32 1, %s1224_s12   ;;  %p1790_p2 = scmp.ne.s32.totalorder %s1784_s27, 0 }
 0x25d   : > { %p1791_p5 = scmp.ge.s32.totalorder %s1244_s17, 2  ;;  %s863_s23 = scalar_lea.sflag [#allocation4], %s862_s22 }
 0x25f   : > { %p1032_p4 = pnand %p1791_p5, %p1790_p2 }
 0x261   : > { %1219 = dma.done.wait (!%p1032_p4), %s863_s23, 1536  }
 0x262   : > { %1221 = vsyncadd (!%p1032_p4), %s863_s23, 4294965760  ;;  %s19_s17 = sadd.s32 1, %s1244_s17   ;;  %s1792_s12 = smov %s1228_s13 }
 0x263   : > { %p16_p7 = scmp.ge.s32.totalorder %s19_s17, 4   ;;  %s1793_s13 = smov %s1232_s14 }
 0x264   : > { %s1794_s14 = smov %s1339_s26  ;;  %s1795_s15 = smov %s1240_s16 }
 0x265   : > { %s1796_s16 = smov %s1798_s20  ;;  %18 = sbr.rel (!%p16_p7) target bundleno = 6 (0x6), region = 105 }
 0x26c   :  { %868 = vsyncpa [#allocation3], 1 }
 0x26d   :  { %870 = vsyncpa [#allocation3 + $0x1], 1 }
 0x26e   :  { %871 = vsyncpa [#allocation4], 1 }
 0x26f   :  { %873 = vsyncpa [#allocation4 + $0x1], 1 }

</bundles_post_ra>
